<compile_context>
chip_gen: v6e
topology: v6e:2x2x1
jax: 0.10.0
libtpu: 0.0.40
codegen_flags: <defaults>
</compile_context>

<pallas_src>
import jax
import jax.numpy as jnp
from jax.experimental import pallas as pl
from jax.experimental.pallas import tpu as pltpu


def _round_up(n: int, m: int) -> int:
    return ((n + m - 1) // m) * m


def mlp_kernel(x_ref, w1_ref, b1_ref, w2_ref, b2_ref, w3_ref, b3_ref, o_ref):
    # ---- linear1 + relu (f32 accumulation on the MXU) ----
    h1 = jnp.dot(x_ref[...], w1_ref[...], preferred_element_type=jnp.float32)
    h1 = jnp.maximum(h1 + b1_ref[...], 0.0)

    # ---- dropout(p=0.2): identity in eval mode ----
    # TODO(synk): training-mode dropout would need pltpu.prng_seed/prng_random_bits masking.

    # ---- linear2 + relu ----
    h2 = jnp.dot(h1.astype(w2_ref.dtype), w2_ref[...],
                 preferred_element_type=jnp.float32)
    h2 = jnp.maximum(h2 + b2_ref[...], 0.0)

    # ---- linear3 ----
    out = jnp.dot(h2.astype(w3_ref.dtype), w3_ref[...],
                  preferred_element_type=jnp.float32)
    o_ref[...] = (out + b3_ref[...]).astype(o_ref.dtype)


def net_forward(x, params, *, block_b: int = 1024, compute_dtype=None):
    """Fused 3-layer MLP forward as a single batch-tiled pallas_call."""
    w1, b1, w2, b2, w3, b3 = params
    B, D_in = x.shape
    H1 = w1.shape[1]          # derive every dim from the params (no hardcoded 64)
    H2 = w2.shape[1]
    D_out = w3.shape[1]
    assert w1.shape[0] == D_in and w2.shape[0] == H1 and w3.shape[0] == H2

    out_dtype = x.dtype                      # final result downcast (intended)
    cdt = out_dtype if compute_dtype is None else compute_dtype

    # Sublane-aligned batch tile.  When the whole batch fits in one block, aim
    # for >=2 tiles so both v7x TensorCores get work (no-op on v5e/v6e).
    if B <= block_b:
        tm = min(_round_up(max(B // 2, 1), 8), _round_up(B, 8))
    else:
        tm = _round_up(block_b, 8)
    B_p = _round_up(B, tm)

    # Only the batch dim is ever padded (and only if tm does not divide B).
    x_c = x.astype(cdt)
    if B_p != B:
        x_c = jnp.pad(x_c, ((0, B_p - B), (0, 0)))

    # Weights/biases are small: casting them is negligible wrapper cost.
    w1_c = w1.astype(cdt)
    w2_c = w2.astype(cdt)
    w3_c = w3.astype(cdt)
    b1_c = jnp.reshape(b1, (1, H1)).astype(jnp.float32)
    b2_c = jnp.reshape(b2, (1, H2)).astype(jnp.float32)
    b3_c = jnp.reshape(b3, (1, D_out)).astype(jnp.float32)

    resident = lambda shape: pl.BlockSpec(shape, lambda i: (0, 0))

    out_p = pl.pallas_call(
        mlp_kernel,
        out_shape=jax.ShapeDtypeStruct((B_p, D_out), out_dtype),
        grid=(B_p // tm,),
        in_specs=[
            pl.BlockSpec((tm, D_in), lambda i: (i, 0)),  # x: streams per tile, unpadded
            resident((D_in, H1)),                         # W1: VMEM-resident
            resident((1, H1)),                            # b1
            resident((H1, H2)),                           # W2
            resident((1, H2)),                            # b2
            resident((H2, D_out)),                        # W3
            resident((1, D_out)),                         # b3
        ],
        out_specs=pl.BlockSpec((tm, D_out), lambda i: (i, 0)),
        compiler_params=pltpu.CompilerParams(
            dimension_semantics=("parallel",),   # v7x: split batch tiles across 2 TCs
        ),
    )(x_c, w1_c, b1_c, w2_c, b2_c, w3_c, b3_c)

    # Strip batch padding only (feature dims were never padded).
    return out_p[:B] if B_p != B else out_p


def init_params(key, D_in, H, D_out, dtype=jnp.float32):
    """Deterministic init mimicking nn.Linear's U(-1/sqrt(fan_in), 1/sqrt(fan_in)).
    Weights are stored transposed from PyTorch convention: W : [in, out]."""
    def linear(key, fan_in, fan_out):
        kw, kb = jax.random.split(key)
        bound = 1.0 / jnp.sqrt(fan_in)
        w = jax.random.uniform(kw, (fan_in, fan_out), dtype, -bound, bound)
        b = jax.random.uniform(kb, (1, fan_out), dtype, -bound, bound)
        return w, b

    k1, k2, k3 = jax.random.split(key, 3)
    w1, b1 = linear(k1, D_in, H)
    w2, b2 = linear(k2, H, 64)
    w3, b3 = linear(k3, 64, D_out)
    return (w1, b1, w2, b2, w3, b3)


def net_forward_ref(x, params):
    """Plain-JAX reference for correctness checking (dropout = identity in eval)."""
    w1, b1, w2, b2, w3, b3 = params
    h = jnp.maximum(x @ w1 + b1, 0.0)
    h = jnp.maximum(h @ w2 + b2, 0.0)
    return h @ w3 + b3


if __name__ == "__main__":
    B, D_in, H, D_out = 8, 32, 64, 16

    key = jax.random.PRNGKey(0)
    kx, kp = jax.random.split(key)
    x = jax.random.normal(kx, (B, D_in), dtype=jnp.float32)
    params = init_params(kp, D_in, H, D_out)

    ref = net_forward_ref(x, params)

    # f32 operand path: tight numerical check.
    out = jax.block_until_ready(net_forward(x, params))
    assert out.shape == (B, D_out)
    assert jnp.allclose(out, ref, atol=1e-5, rtol=1e-5)

    # bf16 operand path (recommended inference config on v6e/v7x): loose check.
    out_bf16 = jax.block_until_ready(
        net_forward(x, params, compute_dtype=jnp.bfloat16))
    assert out_bf16.shape == (B, D_out)
    assert jnp.allclose(out_bf16, ref, atol=1e-1, rtol=1e-1)

    print("KERNEL_OK")
</pallas_src>

<mosaic_0001>
module attributes {stable_mosaic.version = 11 : i64} {
  func.func @mlp_kernel(%arg0: i32, %arg1: memref<8x32xf32, #tpu.memory_space<vmem>>, %arg2: memref<32x64xf32, #tpu.memory_space<vmem>>, %arg3: memref<1x64xf32, #tpu.memory_space<vmem>>, %arg4: memref<64x64xf32, #tpu.memory_space<vmem>>, %arg5: memref<1x64xf32, #tpu.memory_space<vmem>>, %arg6: memref<64x16xf32, #tpu.memory_space<vmem>>, %arg7: memref<1x16xf32, #tpu.memory_space<vmem>>, %arg8: memref<8x16xf32, #tpu.memory_space<vmem>>) attributes {dimension_semantics = [#tpu.dimension_semantics<parallel>], iteration_bounds = array<i64: 1>, scalar_prefetch = 0 : i64, scratch_operands = 0 : i64, tpu.core_type = #tpu.core_type<tc>, window_params = [{transform_indices = @transform_0, window_bounds = array<i64: 8, 32>}, {pipeline_mode = #tpu.pipeline_mode<synchronous>, transform_indices = @transform_1, window_bounds = array<i64: 32, 64>}, {pipeline_mode = #tpu.pipeline_mode<synchronous>, transform_indices = @transform_2, window_bounds = array<i64: 1, 64>}, {pipeline_mode = #tpu.pipeline_mode<synchronous>, transform_indices = @transform_3, window_bounds = array<i64: 64, 64>}, {pipeline_mode = #tpu.pipeline_mode<synchronous>, transform_indices = @transform_4, window_bounds = array<i64: 1, 64>}, {pipeline_mode = #tpu.pipeline_mode<synchronous>, transform_indices = @transform_5, window_bounds = array<i64: 64, 16>}, {pipeline_mode = #tpu.pipeline_mode<synchronous>, transform_indices = @transform_6, window_bounds = array<i64: 1, 16>}, {transform_indices = @transform_7, window_bounds = array<i64: 8, 16>}]} {
    %c0 = arith.constant 0 : index
    %c0_0 = arith.constant 0 : index
    %0 = vector.load %arg1[%c0, %c0_0] : memref<8x32xf32, #tpu.memory_space<vmem>>, vector<8x32xf32>
    %c0_1 = arith.constant 0 : index
    %c0_2 = arith.constant 0 : index
    %1 = vector.load %arg2[%c0_1, %c0_2] : memref<32x64xf32, #tpu.memory_space<vmem>>, vector<32x64xf32>
    %cst = arith.constant dense<0.000000e+00> : vector<8x64xf32>
    %2 = tpu.matmul %0, %1, %cst {dimension_numbers = #tpu.dot_dimension_numbers<[1], [0], [0], [1], [0, 0, 1, 1], [], []>} : vector<8x32xf32>, vector<32x64xf32>, vector<8x64xf32> -> vector<8x64xf32>
    %c0_3 = arith.constant 0 : index
    %c0_4 = arith.constant 0 : index
    %3 = vector.load %arg3[%c0_3, %c0_4] : memref<1x64xf32, #tpu.memory_space<vmem>>, vector<1x64xf32>
    %4 = vector.broadcast %3 : vector<1x64xf32> to vector<8x64xf32>
    %5 = arith.addf %2, %4 : vector<8x64xf32>
    %cst_5 = arith.constant 0.000000e+00 : f32
    %6 = vector.broadcast %cst_5 : f32 to vector<8x64xf32>
    %7 = arith.maximumf %5, %6 : vector<8x64xf32>
    %c0_6 = arith.constant 0 : index
    %c0_7 = arith.constant 0 : index
    %8 = vector.load %arg4[%c0_6, %c0_7] : memref<64x64xf32, #tpu.memory_space<vmem>>, vector<64x64xf32>
    %cst_8 = arith.constant dense<0.000000e+00> : vector<8x64xf32>
    %9 = tpu.matmul %7, %8, %cst_8 {dimension_numbers = #tpu.dot_dimension_numbers<[1], [0], [0], [1], [0, 0, 1, 1], [], []>} : vector<8x64xf32>, vector<64x64xf32>, vector<8x64xf32> -> vector<8x64xf32>
    %c0_9 = arith.constant 0 : index
    %c0_10 = arith.constant 0 : index
    %10 = vector.load %arg5[%c0_9, %c0_10] : memref<1x64xf32, #tpu.memory_space<vmem>>, vector<1x64xf32>
    %11 = vector.broadcast %10 : vector<1x64xf32> to vector<8x64xf32>
    %12 = arith.addf %9, %11 : vector<8x64xf32>
    %cst_11 = arith.constant 0.000000e+00 : f32
    %13 = vector.broadcast %cst_11 : f32 to vector<8x64xf32>
    %14 = arith.maximumf %12, %13 : vector<8x64xf32>
    %c0_12 = arith.constant 0 : index
    %c0_13 = arith.constant 0 : index
    %15 = vector.load %arg6[%c0_12, %c0_13] : memref<64x16xf32, #tpu.memory_space<vmem>>, vector<64x16xf32>
    %cst_14 = arith.constant dense<0.000000e+00> : vector<8x16xf32>
    %16 = tpu.matmul %14, %15, %cst_14 {dimension_numbers = #tpu.dot_dimension_numbers<[1], [0], [0], [1], [0, 0, 1, 1], [], []>} : vector<8x64xf32>, vector<64x16xf32>, vector<8x16xf32> -> vector<8x16xf32>
    %c0_15 = arith.constant 0 : index
    %c0_16 = arith.constant 0 : index
    %17 = vector.load %arg7[%c0_15, %c0_16] : memref<1x16xf32, #tpu.memory_space<vmem>>, vector<1x16xf32>
    %18 = vector.broadcast %17 : vector<1x16xf32> to vector<8x16xf32>
    %19 = arith.addf %16, %18 : vector<8x16xf32>
    %c0_17 = arith.constant 0 : index
    %c0_18 = arith.constant 0 : index
    %20 = vector.load %arg8[%c0_17, %c0_18] : memref<8x16xf32, #tpu.memory_space<vmem>>, vector<8x16xf32>
    tpu.vector_store %arg8[%c0_17, %c0_18], %19 {strides = array<i32>} : memref<8x16xf32, #tpu.memory_space<vmem>>, vector<8x16xf32>,
    return
  }
  func.func @transform_0(%arg0: i32) -> (i32, i32) {
    %c0_i32 = arith.constant 0 : i32
    %c0_i32_0 = arith.constant 0 : i32
    return %arg0, %c0_i32 : i32, i32
  }
  func.func @transform_1(%arg0: i32) -> (i32, i32) {
    %c0_i32 = arith.constant 0 : i32
    %c0_i32_0 = arith.constant 0 : i32
    %c0_i32_1 = arith.constant 0 : i32
    return %c0_i32, %c0_i32_0 : i32, i32
  }
  func.func @transform_2(%arg0: i32) -> (i32, i32) {
    %c0_i32 = arith.constant 0 : i32
    %c0_i32_0 = arith.constant 0 : i32
    %c0_i32_1 = arith.constant 0 : i32
    return %c0_i32, %c0_i32_0 : i32, i32
  }
  func.func @transform_3(%arg0: i32) -> (i32, i32) {
    %c0_i32 = arith.constant 0 : i32
    %c0_i32_0 = arith.constant 0 : i32
    %c0_i32_1 = arith.constant 0 : i32
    return %c0_i32, %c0_i32_0 : i32, i32
  }
  func.func @transform_4(%arg0: i32) -> (i32, i32) {
    %c0_i32 = arith.constant 0 : i32
    %c0_i32_0 = arith.constant 0 : i32
    %c0_i32_1 = arith.constant 0 : i32
    return %c0_i32, %c0_i32_0 : i32, i32
  }
  func.func @transform_5(%arg0: i32) -> (i32, i32) {
    %c0_i32 = arith.constant 0 : i32
    %c0_i32_0 = arith.constant 0 : i32
    %c0_i32_1 = arith.constant 0 : i32
    return %c0_i32, %c0_i32_0 : i32, i32
  }
  func.func @transform_6(%arg0: i32) -> (i32, i32) {
    %c0_i32 = arith.constant 0 : i32
    %c0_i32_0 = arith.constant 0 : i32
    %c0_i32_1 = arith.constant 0 : i32
    return %c0_i32, %c0_i32_0 : i32, i32
  }
  func.func @transform_7(%arg0: i32) -> (i32, i32) {
    %c0_i32 = arith.constant 0 : i32
    %c0_i32_0 = arith.constant 0 : i32
    return %arg0, %c0_i32 : i32, i32
  }
}

</mosaic_0001>

<bundles_post_ra>
// kernel: tpu_custom_call.1
= control target key start
LH: loop header
LB: loop body
LE: loop exit
PB: predicated region body
PF: predicated region fallthrough
CT: control target
= control target key end

     0   :  { %12 = vsyncpa [#allocation3], 0  ;;  %s591_s0 = inlined_call_operand.vmem [shape: f32[8,32], index: 0, kind: input, shape index: {}]   ;;  %s592_s1 = inlined_call_operand.hbm [shape: f32[32,64], index: 1, kind: input, shape index: {}]   ;;  %s593_s2 = inlined_call_operand.vmem [shape: f32[1,64], index: 2, kind: input, shape index: {}]   ;;  %s594_s3 = inlined_call_operand.vmem [shape: f32[64,64], index: 3, kind: input, shape index: {}]   ;;  %s595_s4 = inlined_call_operand.vmem [shape: f32[1,64], index: 4, kind: input, shape index: {}]   ;;  %s596_s5 = inlined_call_operand.vmem [shape: f32[64,16], index: 5, kind: input, shape index: {}]   ;;  %s597_s6 = inlined_call_operand.vmem [shape: f32[1,16], index: 6, kind: input, shape index: {}]   ;;  %s598_s7 = inlined_call_operand.hbm [shape: f32[8,16], index: 7, kind: output, shape index: {}]  }
   0x1   :  { %13 = vsyncpa [#allocation4], 0  ;;  %s451_s24 = smov [#allocation2]  }
   0x2   :  { %s21_s25 = sshll.u32 %s451_s24, 4  ;;  %s22_s25 = int_to_ptr.vmem [resolvable:$true] %s21_s25 }
   0x3   :  { %s415_s26 = scalar_lea.vmem %s22_s25, 512  ;;  %p420_p1 = scmp.lt.s32.totalorder %s22_s25, %s22_s25 }
   0x4   :  { %p416_p0 = scmp.ne.s32.totalorder %s22_s25, %s415_s26  ;;  %p421_p2 = scmp.lt.s32.totalorder %s415_s26, %s415_s26 }
   0x6   :  { %p422_p3 = por %p421_p2, %p420_p1 }
   0x8   :  { %p423_p4 = pnand %p422_p3, %p416_p0 }
   0xa   :  { %426 = shalt.err (!%p423_p4)
}
   0xb   :  { %s452_s27 = smov 128   ;;  %s453_s28 = smov 8  }
   0xc   :  { %27 = dma.hbm_to_vmem [thread:$0]  %s592_s1, 512, %s22_s25, [#allocation3], %s452_s27, %s452_s27, %s453_s28  }
   0xd   :  { %447 = dma.done.wait [#allocation3], 512  }
   0xe   :  { %448 = vsyncadd [#allocation3], 4294966784  ;;  %v454_v0 = vmov 0.0   ;;  %vm455_vm0 = vmmov 0   ;;  %v45_v1 = vld [vmem:[#allocation2 + $0x18] sm:$0xff]  ;;  %v44_v2 = vld [vmem:[#allocation2 + $0x10] sm:$0xff] }
   0xf   :  { %352 = vmatprep.subr.mxu0 %v454_v0  ;;  %360 = vmatprep.mubr.msk.f32.mxu0 %vm455_vm0, %v454_v0  ;;  %v135_v3 = vld [vmem:[%s594_s3 + $0x38] sm:$0xff]  ;;  %v43_v4 = vld [vmem:[#allocation2 + $0x8] sm:$0xff]  ;;  %v134_v5 = vld [vmem:[%s594_s3 + $0x30] sm:$0xff]  ;;  %vm53_vm1 = vcmask 261120   ;;  %vm143_vm2 = vcmask 523264   ;;  %s456_s19 = smov [#allocation5]  }
  0x10   :  { %363 = vmatprep.subr.mxu1 %v454_v0  ;;  %379 = vmatprep.mubr.msk.f32.mxu1 %vm455_vm0, %v454_v0  ;;  %v133_v6 = vld [vmem:[%s594_s3 + $0x28] sm:$0xff]  ;;  %v42_v7 = vld [vmem:[#allocation2] sm:$0xff]  ;;  %v131_v10 = vld [vmem:[%s594_s3 + $0x18] sm:$0xff]  ;;  %s314_s20 = sshll.u32 %s456_s19, 4  ;;  %vm306_vm3 = vcmask 130048   ;;  %s315_s20 = int_to_ptr.vmem [resolvable:$true] %s314_s20 }
  0x11   :  { %353 = vmatpush3.msra.mxu0 %v45_v1  ;;  %364 = vmatpush3.msra.mxu1 %v135_v3  ;;  %v41_v8 = vld [vmem:[%s591_s0] sm:$0xff]  ;;  %v130_v11 = vld [vmem:[%s594_s3 + $0x10] sm:$0xff]  ;;  %v129_v12 = vld [vmem:[%s594_s3 + $0x8] sm:$0xff]  ;;  %p432_p6 = scmp.lt.s32.totalorder %s315_s20, %s315_s20 }
  0x12   :  { %354 = vmatprep.subr.mxu0 %v454_v0  ;;  %365 = vmatprep.subr.mxu1 %v454_v0  ;;  %v132_v9 = vld [vmem:[%s594_s3 + $0x20] sm:$0xff]  ;;  %v225_v14 = vld [vmem:[%s596_s5 + $0x38] sm:$0xff]  ;;  %v224_v15 = vld [vmem:[%s596_s5 + $0x30] sm:$0xff] }
  0x13   :  { %355 = vmatpush3.msra.mxu0 %v44_v2  ;;  %366 = vmatpush3.msra.mxu1 %v134_v5  ;;  %v128_v13 = vld [vmem:[%s594_s3] sm:$0xff]  ;;  %v223_v16 = vld [vmem:[%s596_s5 + $0x28] sm:$0xff]  ;;  %v221_v18 = vld [vmem:[%s596_s5 + $0x18] sm:$0xff] }
  0x14   :  { %356 = vmatprep.subr.mxu0 %v454_v0  ;;  %367 = vmatprep.subr.mxu1 %v454_v0  ;;  %v222_v17 = vld [vmem:[%s596_s5 + $0x20] sm:$0xff]  ;;  %v220_v24 = vld [vmem:[%s596_s5 + $0x10] sm:$0xff]  ;;  %v219_v25 = vld [vmem:[%s596_s5 + $0x8] sm:$0xff] }
  0x15   :  { %357 = vmatpush3.msra.mxu0 %v43_v4  ;;  %368 = vmatpush3.msra.mxu1 %v133_v6  ;;  %v323_v19 = vld [vmem:[%s593_s2] ss:$0 sm:$0xff] }
  0x16   :  { %358 = vmatprep.subr.mxu0 %v454_v0  ;;  %369 = vmatprep.subr.mxu1 %v454_v0  ;;  %v218_v26 = vld [vmem:[%s596_s5] sm:$0xff]  ;;  %s427_s5 = scalar_lea.vmem %s315_s20, 128 }
  0x17   :  { %359 = vmatpush3.msra.mxu0 %v42_v7  ;;  %370 = vmatpush3.msra.mxu1 %v132_v9  ;;  %v325_v27 = vld [vmem:[%s595_s4] ss:$0 sm:$0xff]  ;;  %p428_p5 = scmp.ne.s32.totalorder %s315_s20, %s427_s5  ;;  %p433_p7 = scmp.lt.s32.totalorder %s427_s5, %s427_s5 }
  0x18   :  { %361 = vmatmul.mubr.msk.f32.vlgmr.msra.gmra.mxu0 %vm53_vm1, %v41_v8  ;;  %371 = vmatprep.subr.mxu1 %v454_v0  ;;  %v327_v32 = vld [vmem:[%s597_s6] ss:$0 sm:$0xff] }
  0x19   :  { %382 = vmatprep.subr.mxu0 %v454_v0  ;;  %372 = vmatpush3.msra.mxu1 %v131_v10  ;;  %p434_p8 = por %p433_p7, %p432_p6 }
  0x1a   :  { %398 = vmatprep.mubr.msk.f32.mxu0 %vm455_vm0, %v454_v0  ;;  %373 = vmatprep.subr.mxu1 %v454_v0 }
  0x1b   :  { %374 = vmatpush3.msra.mxu1 %v130_v11  ;;  %383 = vmatpush3.msra.mxu0 %v225_v14  ;;  %p435_p9 = pnand %p434_p8, %p428_p5 }
  0x1c   :  { %375 = vmatprep.subr.mxu1 %v454_v0  ;;  %384 = vmatprep.subr.mxu0 %v454_v0 }
  0x1d   :  { %376 = vmatpush3.msra.mxu1 %v129_v12  ;;  %385 = vmatpush3.msra.mxu0 %v224_v15 }
  0x1e   :  { %377 = vmatprep.subr.mxu1 %v454_v0  ;;  %386 = vmatprep.subr.mxu0 %v454_v0 }
  0x1f   :  { %378 = vmatpush3.msra.mxu1 %v128_v13  ;;  %387 = vmatpush3.msra.mxu0 %v223_v16 }
  0x20   :  { %388 = vmatprep.subr.mxu0 %v454_v0 }
  0x21   :  { %389 = vmatpush3.msra.mxu0 %v222_v17 }
  0x22   :  { %390 = vmatprep.subr.mxu0 %v454_v0 }
  0x23   :  { %391 = vmatpush3.msra.mxu0 %v221_v18 }
  0x24   :  { %392 = vmatprep.subr.mxu0 %v454_v0 }
  0x25   :  { %393 = vmatpush3.msra.mxu0 %v220_v24 }
  0x26   :  { %394 = vmatprep.subr.mxu0 %v454_v0 }
  0x27   :  { %395 = vmatpush3.msra.mxu0 %v219_v25 }
  0x28   :  { %396 = vmatprep.subr.mxu0 %v454_v0 }
  0x29   :  { %397 = vmatpush3.msra.mxu0 %v218_v26 }
  0xd8   :  { %v123_v20 = vpop.f32.mrf.mxu0 }
  0xd9   :  { %v124_v21 = vadd.f32 %v323_v19, %v123_v20 }
  0xda   :  { %v362_v22 = vpop.f32.mrf.mxu0 }
  0xdb   :  { %v127_v23 = vmax.f32 %v124_v21, 0.0 }
  0xdd   :  { %380 = vmatmul.mubr.msk.f32.vlgmr.msra.gmra.mxu1 %vm143_vm2, %v127_v23 }
 0x19d   :  { %v213_v28 = vpop.f32.mrf.mxu1 }
 0x19e   :  { %v214_v29 = vadd.f32 %v325_v27, %v213_v28 }
 0x19f   :  { %v381_v30 = vpop.f32.mrf.mxu1 }
 0x1a0   :  { %v217_v31 = vmax.f32 %v214_v29, 0.0 }
 0x1a2   :  { %399 = vmatmul.mubr.msk.f32.vlgmr.msra.gmra.mxu0 %vm143_vm2, %v217_v31 }
 0x262   :  { %v302_v33 = vpop.f32.mrf.mxu0 }
 0x263   :  { %v303_v34 = vadd.f32 %v327_v32, %v302_v33 }
 0x264   :  { %v400_v35 = vpop.f32.mrf.mxu0 }
 0x265   :  { %307 = vst.msk [vmem:[#allocation5] sm:$0xff] %vm306_vm3, %v303_v34 }
 0x266   :  { %438 = shalt.err (!%p435_p9)
}
 0x267   :  { %317 = dma.vmem_to_hbm [thread:$0]  %s315_s20, 128, %s598_s7, [#allocation4]  }
 0x268   :  { %449 = dma.done.wait [#allocation4], 128  }
 0x269   :  { %450 = vsyncadd [#allocation4], 4294967168 }
 0x26a   :  { %321 = vsyncpa [#allocation3], 1 }
 0x26b   :  { %322 = vsyncpa [#allocation4], 1 }

</bundles_post_ra>
